<compile_context>
chip_gen: v7x
topology: tpu7x:2x2x1
jax: 0.10.0
libtpu: 0.0.40
codegen_flags: <defaults>
</compile_context>

<pallas_src>
import jax
import jax.numpy as jnp
from jax.experimental import pallas as pl
from jax.experimental.pallas import tpu as pltpu

BN_EPS = 1e-5
HIDDEN = 512
OUT_FEATURES = 10
OUT_PADDED = 128  # lane-dense output width (multiple of 128; matches v5e MXU exactly)


def subnetwork_kernel(x_ref, w1_ref, b1_ref, w2_ref, b2_ref, o_ref):
    # x arrives as f32; cast to bf16 in-kernel (avoids a separate HBM bf16 copy of x).
    x = x_ref[...].astype(jnp.bfloat16)
    # fc1 with BatchNorm folded into (w1, b1): bf16 MXU matmul, f32 accumulate, f32 bias.
    h = jnp.dot(x, w1_ref[...], preferred_element_type=jnp.float32) + b1_ref[...]
    # ReLU
    h = jnp.maximum(h, 0.0)
    # Dropout(p=0.5) in eval mode == identity.
    # fc2 to the lane-dense padded width: bf16 MXU matmul, f32 accumulate, f32 bias.
    o = jnp.dot(h.astype(jnp.bfloat16), w2_ref[...],
                preferred_element_type=jnp.float32) + b2_ref[...]
    # Cast only on the final store (bf16 output halves the dominant HBM write stream).
    o_ref[...] = o.astype(o_ref.dtype)


def prepare_params(params):
    """One-time weight prep: fold eval-mode BatchNorm1d into fc1, pad fc2 to a
    lane-dense 128-wide output, and cast matmul operands to bf16."""
    scale = params["gamma"] * jax.lax.rsqrt(params["running_var"] + BN_EPS)   # (1, H)
    w1f = params["w1t"] * scale                                               # (D, H)
    b1f = (params["b1"] - params["running_mean"]) * scale + params["beta"]    # (1, H)

    H = params["w1t"].shape[1]
    out_f = params["w2t"].shape[1]
    w2p = jnp.zeros((H, OUT_PADDED), jnp.float32).at[:, :out_f].set(params["w2t"])
    b2p = jnp.zeros((1, OUT_PADDED), jnp.float32).at[:, :out_f].set(params["b2"])

    return {
        "w1": w1f.astype(jnp.bfloat16),   # (D, H) bf16
        "b1": b1f,                        # (1, H) f32
        "w2": w2p.astype(jnp.bfloat16),   # (H, 128) bf16
        "b2": b2p,                        # (1, 128) f32
        "out_features": out_f,            # static python int
    }


def subnetwork_forward(x, prep, *, batch_tile=1024, vmem_limit_bytes=48 * 1024 * 1024):
    B, D = x.shape
    H = prep["w1"].shape[1]
    out_f = prep["out_features"]

    # --- batch tiling: big tiles amortize per-step overhead; weights stay resident ---
    tb = max(8, min(batch_tile, B))
    tb = ((tb + 7) // 8) * 8  # sublane-align

    # Conservative per-step VMEM estimate (double-buffered x/out, f32 hidden temp,
    # resident weights). Halve the tile until it fits well under v7x's 64 MiB VMEM.
    def step_bytes(t):
        return (2 * t * D * 4                 # x tile f32, double-buffered
                + t * H * 4                   # f32 hidden temporary
                + 2 * t * OUT_PADDED * 2      # bf16 output tile, double-buffered
                + D * H * 2 + H * OUT_PADDED * 2 + H * 4 + OUT_PADDED * 4)  # weights/biases

    budget = 40 * 1024 * 1024
    while tb > 8 and step_bytes(tb) > budget:
        tb = max(8, ((tb // 2 + 7) // 8) * 8)

    Bp = pl.cdiv(B, tb) * tb
    xp = x if Bp == B else jnp.pad(x, ((0, Bp - B), (0, 0)))

    flops = 2 * Bp * (D * H + H * OUT_PADDED)
    bytes_accessed = (xp.size * 4                       # x f32 read
                      + prep["w1"].size * 2 + prep["w2"].size * 2
                      + prep["b1"].size * 4 + prep["b2"].size * 4
                      + Bp * OUT_PADDED * 2)            # bf16 output write

    out = pl.pallas_call(
        subnetwork_kernel,
        out_shape=jax.ShapeDtypeStruct((Bp, OUT_PADDED), jnp.bfloat16),
        grid=(Bp // tb,),
        in_specs=[
            pl.BlockSpec((tb, D), lambda i: (i, 0)),           # x batch tile (f32)
            pl.BlockSpec((D, H), lambda i: (0, 0)),            # fc1 weight (BN folded), resident
            pl.BlockSpec((1, H), lambda i: (0, 0)),            # fc1 bias (BN folded), resident
            pl.BlockSpec((H, OUT_PADDED), lambda i: (0, 0)),   # fc2 weight (padded), resident
            pl.BlockSpec((1, OUT_PADDED), lambda i: (0, 0)),   # fc2 bias (padded), resident
        ],
        out_specs=pl.BlockSpec((tb, OUT_PADDED), lambda i: (i, 0)),
        compiler_params=pltpu.CompilerParams(
            dimension_semantics=("parallel",),
            vmem_limit_bytes=vmem_limit_bytes),
        cost_estimate=pl.CostEstimate(
            flops=flops, transcendentals=0, bytes_accessed=bytes_accessed),
    )(xp, prep["w1"], prep["b1"], prep["w2"], prep["b2"])

    # Slice the (cheap) bf16 padded block back to the logical shape; fuses under jit.
    return out[:B, :out_f]


def init_params(key, input_size, hidden=HIDDEN, out=OUT_FEATURES):
    """Deterministic init mirroring PyTorch defaults (uniform +-1/sqrt(fan_in) for Linear,
    gamma=1 / beta=0 / running_mean=0 / running_var=1 for BatchNorm1d)."""
    k1, k2, k3, k4 = jax.random.split(key, 4)
    bound1 = 1.0 / jnp.sqrt(input_size)
    bound2 = 1.0 / jnp.sqrt(hidden)
    # Linear weights stored pre-transposed: (in_features, out_features)
    w1t = jax.random.uniform(k1, (input_size, hidden), jnp.float32, -bound1, bound1)
    b1 = jax.random.uniform(k2, (1, hidden), jnp.float32, -bound1, bound1)
    w2t = jax.random.uniform(k3, (hidden, out), jnp.float32, -bound2, bound2)
    b2 = jax.random.uniform(k4, (1, out), jnp.float32, -bound2, bound2)
    return {
        "w1t": w1t, "b1": b1,
        "gamma": jnp.ones((1, hidden), jnp.float32),
        "beta": jnp.zeros((1, hidden), jnp.float32),
        "running_mean": jnp.zeros((1, hidden), jnp.float32),
        "running_var": jnp.ones((1, hidden), jnp.float32),
        "w2t": w2t, "b2": b2,
    }


def reference_forward(x, p):
    """Pure-JAX f32 reference of the PyTorch eval() forward."""
    h = x @ p["w1t"] + p["b1"]
    h = (h - p["running_mean"]) * jax.lax.rsqrt(p["running_var"] + BN_EPS) * p["gamma"] + p["beta"]
    h = jnp.maximum(h, 0.0)
    return h @ p["w2t"] + p["b2"]


if __name__ == "__main__":
    key = jax.random.PRNGKey(0)
    kx, kp = jax.random.split(key)

    B, INPUT_SIZE = 8, 32  # small demo shapes; B multiple of 8 for sublane alignment
    x = jax.random.normal(kx, (B, INPUT_SIZE), jnp.float32)
    params = init_params(kp, INPUT_SIZE)

    prep = prepare_params(params)             # one-time weight prep (BN fold, pad, bf16)
    out = subnetwork_forward(x, prep)
    out = jax.block_until_ready(out)

    ref = reference_forward(x, params)
    assert out.shape == (B, OUT_FEATURES)
    # bf16 matmul operands + bf16 output -> compare to f32 reference with bf16 tolerance.
    assert jnp.allclose(out.astype(jnp.float32), ref, atol=5e-2, rtol=5e-2), \
        "mismatch vs pure-JAX reference"

    print("KERNEL_OK")
</pallas_src>

<mosaic_0001>
module attributes {stable_mosaic.version = 11 : i64} {
  func.func @subnetwork_kernel(%arg0: i32, %arg1: memref<8x32xf32, #tpu.memory_space<vmem>>, %arg2: memref<32x512xbf16, #tpu.memory_space<vmem>>, %arg3: memref<1x512xf32, #tpu.memory_space<vmem>>, %arg4: memref<512x128xbf16, #tpu.memory_space<vmem>>, %arg5: memref<1x128xf32, #tpu.memory_space<vmem>>, %arg6: memref<8x128xbf16, #tpu.memory_space<vmem>>) attributes {dimension_semantics = [#tpu.dimension_semantics<parallel>], iteration_bounds = array<i64: 1>, scalar_prefetch = 0 : i64, scratch_operands = 0 : i64, tpu.core_type = #tpu.core_type<tc>, window_params = [{transform_indices = @transform_0, window_bounds = array<i64: 8, 32>}, {pipeline_mode = #tpu.pipeline_mode<synchronous>, transform_indices = @transform_1, window_bounds = array<i64: 32, 512>}, {pipeline_mode = #tpu.pipeline_mode<synchronous>, transform_indices = @transform_2, window_bounds = array<i64: 1, 512>}, {pipeline_mode = #tpu.pipeline_mode<synchronous>, transform_indices = @transform_3, window_bounds = array<i64: 512, 128>}, {pipeline_mode = #tpu.pipeline_mode<synchronous>, transform_indices = @transform_4, window_bounds = array<i64: 1, 128>}, {transform_indices = @transform_5, window_bounds = array<i64: 8, 128>}]} {
    %c0 = arith.constant 0 : index
    %c0_0 = arith.constant 0 : index
    %0 = vector.load %arg1[%c0, %c0_0] : memref<8x32xf32, #tpu.memory_space<vmem>>, vector<8x32xf32>
    %1 = arith.truncf %0 : vector<8x32xf32> to vector<8x32xbf16>
    %c0_1 = arith.constant 0 : index
    %c0_2 = arith.constant 0 : index
    %2 = vector.load %arg2[%c0_1, %c0_2] : memref<32x512xbf16, #tpu.memory_space<vmem>>, vector<32x512xbf16>
    %cst = arith.constant dense<0.000000e+00> : vector<8x512xf32>
    %3 = tpu.matmul %1, %2, %cst {dimension_numbers = #tpu.dot_dimension_numbers<[1], [0], [0], [1], [0, 0, 1, 1], [], []>} : vector<8x32xbf16>, vector<32x512xbf16>, vector<8x512xf32> -> vector<8x512xf32>
    %c0_3 = arith.constant 0 : index
    %c0_4 = arith.constant 0 : index
    %4 = vector.load %arg3[%c0_3, %c0_4] : memref<1x512xf32, #tpu.memory_space<vmem>>, vector<1x512xf32>
    %5 = vector.broadcast %4 : vector<1x512xf32> to vector<8x512xf32>
    %6 = arith.addf %3, %5 : vector<8x512xf32>
    %cst_5 = arith.constant 0.000000e+00 : f32
    %7 = vector.broadcast %cst_5 : f32 to vector<8x512xf32>
    %8 = arith.maximumf %6, %7 : vector<8x512xf32>
    %9 = arith.truncf %8 : vector<8x512xf32> to vector<8x512xbf16>
    %c0_6 = arith.constant 0 : index
    %c0_7 = arith.constant 0 : index
    %10 = vector.load %arg4[%c0_6, %c0_7] : memref<512x128xbf16, #tpu.memory_space<vmem>>, vector<512x128xbf16>
    %cst_8 = arith.constant dense<0.000000e+00> : vector<8x128xf32>
    %11 = tpu.matmul %9, %10, %cst_8 {dimension_numbers = #tpu.dot_dimension_numbers<[1], [0], [0], [1], [0, 0, 1, 1], [], []>} : vector<8x512xbf16>, vector<512x128xbf16>, vector<8x128xf32> -> vector<8x128xf32>
    %c0_9 = arith.constant 0 : index
    %c0_10 = arith.constant 0 : index
    %12 = vector.load %arg5[%c0_9, %c0_10] : memref<1x128xf32, #tpu.memory_space<vmem>>, vector<1x128xf32>
    %13 = vector.broadcast %12 : vector<1x128xf32> to vector<8x128xf32>
    %14 = arith.addf %11, %13 : vector<8x128xf32>
    %15 = arith.truncf %14 : vector<8x128xf32> to vector<8x128xbf16>
    %c0_11 = arith.constant 0 : index
    %c0_12 = arith.constant 0 : index
    %16 = vector.load %arg6[%c0_11, %c0_12] : memref<8x128xbf16, #tpu.memory_space<vmem>>, vector<8x128xbf16>
    tpu.vector_store %arg6[%c0_11, %c0_12], %15 {strides = array<i32>} : memref<8x128xbf16, #tpu.memory_space<vmem>>, vector<8x128xbf16>,
    return
  }
  func.func @transform_0(%arg0: i32) -> (i32, i32) {
    %c0_i32 = arith.constant 0 : i32
    %c0_i32_0 = arith.constant 0 : i32
    return %arg0, %c0_i32 : i32, i32
  }
  func.func @transform_1(%arg0: i32) -> (i32, i32) {
    %c0_i32 = arith.constant 0 : i32
    %c0_i32_0 = arith.constant 0 : i32
    %c0_i32_1 = arith.constant 0 : i32
    return %c0_i32, %c0_i32_0 : i32, i32
  }
  func.func @transform_2(%arg0: i32) -> (i32, i32) {
    %c0_i32 = arith.constant 0 : i32
    %c0_i32_0 = arith.constant 0 : i32
    %c0_i32_1 = arith.constant 0 : i32
    return %c0_i32, %c0_i32_0 : i32, i32
  }
  func.func @transform_3(%arg0: i32) -> (i32, i32) {
    %c0_i32 = arith.constant 0 : i32
    %c0_i32_0 = arith.constant 0 : i32
    %c0_i32_1 = arith.constant 0 : i32
    return %c0_i32, %c0_i32_0 : i32, i32
  }
  func.func @transform_4(%arg0: i32) -> (i32, i32) {
    %c0_i32 = arith.constant 0 : i32
    %c0_i32_0 = arith.constant 0 : i32
    %c0_i32_1 = arith.constant 0 : i32
    return %c0_i32, %c0_i32_0 : i32, i32
  }
  func.func @transform_5(%arg0: i32) -> (i32, i32) {
    %c0_i32 = arith.constant 0 : i32
    %c0_i32_0 = arith.constant 0 : i32
    return %arg0, %c0_i32 : i32, i32
  }
}

</mosaic_0001>

<bundles_post_ra>
// kernel: tpu_custom_call.1
= control target key start
LH: loop header
LB: loop body
LE: loop exit
PB: predicated region body
PF: predicated region fallthrough
CT: control target
= control target key end

     0   :  { %10 = vsyncpa [#allocation3], 0  ;;  %s915_s0 = inlined_call_operand.hbm [shape: f32[8,32], index: 0, kind: input, shape index: {}]   ;;  %s916_s1 = inlined_call_operand.hbm [shape: bf16[32,512], index: 1, kind: input, shape index: {}]   ;;  %s917_s2 = inlined_call_operand.vmem [shape: f32[1,512], index: 2, kind: input, shape index: {}]   ;;  %s918_s3 = inlined_call_operand.hbm [shape: bf16[512,128], index: 3, kind: input, shape index: {}]   ;;  %s919_s4 = inlined_call_operand.vmem [shape: f32[1,128], index: 4, kind: input, shape index: {}]   ;;  %s920_s5 = inlined_call_operand.hbm [shape: bf16[8,128], index: 5, kind: output, shape index: {}]  }
   0x1   :  { %11 = vsyncpa [#allocation6], 0 }
   0x2   :  { %12 = vsyncpa [#allocation4], 0  ;;  %s822_s18 = smov [#allocation5]   ;;  %s728_s22 = scalar_lea.hbm %s916_s1, 1024 }
   0x3   :  { %s28_s19 = sshll.u32 %s822_s18, 4  ;;  %p729_p0 = scmp.ne.s32.totalorder %s916_s1, %s728_s22  ;;  %s29_s19 = int_to_ptr.vmem [resolvable:$true] %s28_s19 }
   0x4   :  { %p732_p1 = scmp.lt.u32.totalorder %s728_s22, %s916_s1 }
   0x6   :  { %p734_p2 = pnand %p732_p1, %p729_p0 }
   0x8   :  { %737 = shalt.err (!%p734_p2)
}
   0x9   :  { %s738_s27 = scalar_lea.vmem %s29_s19, 1024  ;;  %p743_p4 = scmp.lt.s32.totalorder %s29_s19, %s29_s19 }
   0xa   :  { %p739_p3 = scmp.ne.s32.totalorder %s29_s19, %s738_s27  ;;  %p744_p5 = scmp.lt.s32.totalorder %s738_s27, %s738_s27 }
   0xc   :  { %p745_p6 = por %p744_p5, %p743_p4 }
   0xe   :  { %p746_p7 = pnand %p745_p6, %p739_p3 }
  0x10   :  { %749 = shalt.err (!%p746_p7)
}
  0x11   :  { %s823_s28 = smov 256   ;;  %s824_s29 = smov 16  }
  0x12   :  { %34 = dma.hbm_to_vmem [thread:$0]  %s916_s1, 1024, %s29_s19, [#allocation6], %s823_s28, %s823_s28, %s824_s29  }
  0x13   :  { %s825_s7 = smov [#allocation2]   ;;  %s826_s9 = smov [#allocation7]  }
  0x14   :  { %s19_s8 = sshll.u32 %s825_s7, 4  ;;  %s42_s10 = sshll.u32 %s826_s9, 4  ;;  %s20_s8 = int_to_ptr.vmem [resolvable:$true] %s19_s8  ;;  %s43_s10 = int_to_ptr.vmem [resolvable:$true] %s42_s10 }
  0x15   :  { %s750_s13 = scalar_lea.hbm %s915_s0, 128 }
  0x16   :  { %p751_p8 = scmp.ne.s32.totalorder %s915_s0, %s750_s13  ;;  %p754_p9 = scmp.lt.u32.totalorder %s750_s13, %s915_s0 }
  0x18   :  { %p756_p10 = pnand %p754_p9, %p751_p8 }
  0x1a   :  { %759 = shalt.err (!%p756_p10)
}
  0x1b   :  { %s760_s1 = scalar_lea.vmem %s20_s8, 128  ;;  %p765_p12 = scmp.lt.s32.totalorder %s20_s8, %s20_s8 }
  0x1c   :  { %p761_p11 = scmp.ne.s32.totalorder %s20_s8, %s760_s1  ;;  %p766_p13 = scmp.lt.s32.totalorder %s760_s1, %s760_s1 }
  0x1e   :  { %p767_p0 = por %p766_p13, %p765_p12 }
  0x20   :  { %p768_p1 = pnand %p767_p0, %p761_p11 }
  0x22   :  { %771 = shalt.err (!%p768_p1)
}
  0x23   :  { %22 = dma.hbm_to_vmem [thread:$0]  %s915_s0, 128, %s20_s8, [#allocation3]  }
  0x24   :  { %s772_s22 = scalar_lea.hbm %s918_s3, 4096 }
  0x25   :  { %p773_p2 = scmp.ne.s32.totalorder %s918_s3, %s772_s22  ;;  %p776_p3 = scmp.lt.u32.totalorder %s772_s22, %s918_s3 }
  0x27   :  { %p778_p4 = pnand %p776_p3, %p773_p2 }
  0x29   :  { %781 = shalt.err (!%p778_p4)
}
  0x2a   :  { %s782_s27 = scalar_lea.vmem %s43_s10, 4096  ;;  %p787_p6 = scmp.lt.s32.totalorder %s43_s10, %s43_s10 }
  0x2b   :  { %p783_p5 = scmp.ne.s32.totalorder %s43_s10, %s782_s27  ;;  %p788_p7 = scmp.lt.s32.totalorder %s782_s27, %s782_s27 }
  0x2d   :  { %p789_p8 = por %p788_p7, %p787_p6 }
  0x2f   :  { %p790_p9 = pnand %p789_p8, %p783_p5 }
  0x31   :  { %793 = shalt.err (!%p790_p9)
}
  0x32   :  { %s827_s0 = smov 64   ;;  %s828_s28 = smov 4  }
  0x33   :  { %48 = dma.hbm_to_vmem [thread:$0]  %s918_s3, 4096, %s43_s10, [#allocation6], %s827_s0, %s827_s0, %s828_s28  }
  0x34   :  { %816 = dma.done.wait [#allocation3], 128  }
  0x35   :  { %817 = vsyncadd [#allocation3], 4294967168 }
  0x36   :  { %818 = dma.done.wait [#allocation6], 5120  }
  0x37   :  { %819 = vsyncadd [#allocation6], 4294962176  ;;  %v829_v0 = vmov 0   ;;  %v684_v1 = vld [vmem:[#allocation5 + $0x4] ss:$16 sps:$4 sm:$0xff]   ;;  %v61_v9 = vld [vmem:[#allocation2] sm:$0xff]  ;;  %v73_v43 = vlaneseq }
  0x38   :  { %169 = vmatprep.mubr.bf16.mxu0 %v829_v0  ;;  %210 = vmatprep.mubr.bf16.mxu1 %v829_v0  ;;  %v686_v2 = vld [vmem:[#allocation5 + $0xc] ss:$16 sps:$4 sm:$0xff]   ;;  %v688_v3 = vld [vmem:[#allocation5] ss:$16 sps:$4 sm:$0xff]   ;;  %v689_v4 = vld [vmem:[#allocation5 + $0x8] ss:$16 sps:$4 sm:$0xff]   ;;  %v62_v11 = vpack.c.bf16 %v61_v9, %v61_v9 }
  0x39   :  { %137 = vmatprep.subr.bf16.mxu0 %v684_v1  ;;  %178 = vmatprep.subr.bf16.mxu1 %v686_v2  ;;  %v690_v5 = vld [vmem:[#allocation5 + $0x24] ss:$16 sps:$4 sm:$0xff]   ;;  %v692_v6 = vld [vmem:[#allocation5 + $0x2c] ss:$16 sps:$4 sm:$0xff]   ;;  %v694_v7 = vld [vmem:[#allocation5 + $0x20] ss:$16 sps:$4 sm:$0xff]  }
  0x3a   :  { %138 = vmatpush1.bf16.msra.mxu0 %v688_v3  ;;  %179 = vmatpush1.bf16.msra.mxu1 %v689_v4  ;;  %v695_v8 = vld [vmem:[#allocation5 + $0x28] ss:$16 sps:$4 sm:$0xff]   ;;  %v696_v10 = vld [vmem:[#allocation7 + $0x40] sm:$0xff]   ;;  %vm133_vm0 = vcmask 261120   ;;  %v704_v19 = vld [vmem:[#allocation7 + $0x50] sm:$0xff]   ;;  %v74_v44 = vshrl.u32 %v73_v43, 7 }
  0x3b   :  { %139 = vmatprep.subr.bf16.mxu0 %v690_v5  ;;  %180 = vmatprep.subr.bf16.mxu1 %v692_v6  ;;  %v697_v12 = vld [vmem:[#allocation7 + $0xc0] sm:$0xff]   ;;  %v700_v15 = vld [vmem:[#allocation7 + $0x48] sm:$0xff]   ;;  %v705_v20 = vld [vmem:[#allocation7 + $0xd0] sm:$0xff]   ;;  %s830_s8 = smov [#allocation8]  }
  0x3c   :  { %v698_v13 = vld [vmem:[#allocation7] sm:$0xff]   ;;  %v701_v16 = vld [vmem:[#allocation7 + $0xc8] sm:$0xff]   ;;  %v706_v21 = vld [vmem:[#allocation7 + $0x10] sm:$0xff]   ;;  %v75_v45 = vsub.s32 0, %v74_v44  ;;  %v83_v46 = vsub.s32 2, %v74_v44  ;;  %v79_v48 = vsub.s32 1, %v74_v44 }
  0x3d   :  { %v699_v14 = vld [vmem:[#allocation7 + $0x80] sm:$0xff]   ;;  %v702_v17 = vld [vmem:[#allocation7 + $0x8] sm:$0xff]   ;;  %v707_v22 = vld [vmem:[#allocation7 + $0x90] sm:$0xff]   ;;  %v87_v49 = vsub.s32 3, %v74_v44  ;;  %s578_s9 = sshll.u32 %s830_s8, 4  ;;  %s579_s9 = int_to_ptr.vmem [resolvable:$true] %s578_s9 }
  0x3e   :  { %140 = vmatpush1.bf16.msra.mxu0 %v694_v7  ;;  %181 = vmatpush1.bf16.msra.mxu1 %v695_v8  ;;  %v703_v18 = vld [vmem:[#allocation7 + $0x88] sm:$0xff]   ;;  %v708_v23 = vld [vmem:[#allocation7 + $0x58] sm:$0xff]   ;;  %v712_v27 = vld [vmem:[#allocation7 + $0x60] sm:$0xff]   ;;  %s794_s10 = scalar_lea.vmem %s579_s9, 64  ;;  %p799_p11 = scmp.lt.s32.totalorder %s579_s9, %s579_s9 }
  0x3f   :  { %631 = vmatprep.subr.bf16.mxu0 %v696_v10  ;;  %653 = vmatprep.subr.bf16.mxu1 %v697_v12  ;;  %v709_v24 = vld [vmem:[#allocation7 + $0xd8] sm:$0xff]   ;;  %v713_v28 = vld [vmem:[#allocation7 + $0xe0] sm:$0xff]   ;;  %v716_v31 = vld [vmem:[#allocation7 + $0x68] sm:$0xff]   ;;  %p795_p10 = scmp.ne.s32.totalorder %s579_s9, %s794_s10  ;;  %p800_p12 = scmp.lt.s32.totalorder %s794_s10, %s794_s10 }
  0x40   :  { %v710_v25 = vld [vmem:[#allocation7 + $0x18] sm:$0xff]   ;;  %v714_v29 = vld [vmem:[#allocation7 + $0x20] sm:$0xff]   ;;  %v717_v32 = vld [vmem:[#allocation7 + $0xe8] sm:$0xff]  }
  0x41   :  { %596 = vmatmul.mubr.msk.bf16.vlgmr.msra.gmra.mrb[0].mxu0 %vm133_vm0, %v62_v11  ;;  %597 = vmatmul.mubr.msk.bf16.vlgmr.msra.gmra.mrb[0].mxu1 %vm133_vm0, %v62_v11  ;;  %v711_v26 = vld [vmem:[#allocation7 + $0x98] sm:$0xff]   ;;  %v715_v30 = vld [vmem:[#allocation7 + $0xa0] sm:$0xff]   ;;  %v718_v33 = vld [vmem:[#allocation7 + $0x28] sm:$0xff]   ;;  %p801_p13 = por %p800_p12, %p799_p11 }
  0x42   :  { %632 = vmatpush3.bf16.msra.mxu0 %v698_v13  ;;  %654 = vmatpush3.bf16.msra.mxu1 %v699_v14  ;;  %v719_v34 = vld [vmem:[#allocation7 + $0xa8] sm:$0xff]   ;;  %v720_v35 = vld [vmem:[#allocation7 + $0x70] sm:$0xff]   ;;  %v724_v39 = vld [vmem:[#allocation7 + $0x78] sm:$0xff]  }
  0x43   :  { %633 = vmatprep.subr.bf16.mxu0 %v700_v15  ;;  %655 = vmatprep.subr.bf16.mxu1 %v701_v16  ;;  %v721_v36 = vld [vmem:[#allocation7 + $0xf0] sm:$0xff]   ;;  %v725_v40 = vld [vmem:[#allocation7 + $0xf8] sm:$0xff]   ;;  %p802_p0 = pnand %p801_p13, %p795_p10 }
  0x44   :  { %v722_v37 = vld [vmem:[#allocation7 + $0x30] sm:$0xff]   ;;  %v726_v41 = vld [vmem:[#allocation7 + $0x38] sm:$0xff]  }
  0x45   :  { %v723_v38 = vld [vmem:[#allocation7 + $0xb0] sm:$0xff]   ;;  %v727_v42 = vld [vmem:[#allocation7 + $0xb8] sm:$0xff]  }
  0x46   :  { %634 = vmatpush3.bf16.msra.mxu0 %v702_v17  ;;  %656 = vmatpush3.bf16.msra.mxu1 %v703_v18  ;;  %v71_v47 = vld [vmem:[%s917_s2] sm:$0xf] }
  0x47   :  { %635 = vmatprep.subr.bf16.mxu0 %v704_v19  ;;  %657 = vmatprep.subr.bf16.mxu1 %v705_v20  ;;  %v76_v50 = vrot.slane %v71_v47, %v75_v45  ;;  %v84_v51 = vrot.slane %v71_v47, %v83_v46  ;;  %v80_v52 = vrot.slane %v71_v47, %v79_v48  ;;  %v598_v12 = vld [vmem:[%s919_s4] ss:$0 sm:$0xff] }
  0x48   :  { %v88_v53 = vrot.slane %v71_v47, %v87_v49 }
  0x4a   :  { %636 = vmatpush3.bf16.msra.mxu0 %v706_v21  ;;  %658 = vmatpush3.bf16.msra.mxu1 %v707_v22 }
  0x4b   :  { %637 = vmatprep.subr.bf16.mxu0 %v708_v23  ;;  %659 = vmatprep.subr.bf16.mxu1 %v709_v24 }
  0x4e   :  { %638 = vmatpush3.bf16.msra.mxu0 %v710_v25  ;;  %660 = vmatpush3.bf16.msra.mxu1 %v711_v26 }
  0x4f   :  { %639 = vmatprep.subr.bf16.mxu0 %v712_v27  ;;  %661 = vmatprep.subr.bf16.mxu1 %v713_v28 }
  0x52   :  { %640 = vmatpush3.bf16.msra.mxu0 %v714_v29  ;;  %662 = vmatpush3.bf16.msra.mxu1 %v715_v30 }
  0x53   :  { %641 = vmatprep.subr.bf16.mxu0 %v716_v31  ;;  %663 = vmatprep.subr.bf16.mxu1 %v717_v32 }
  0x56   :  { %642 = vmatpush3.bf16.msra.mxu0 %v718_v33  ;;  %664 = vmatpush3.bf16.msra.mxu1 %v719_v34 }
  0x57   :  { %643 = vmatprep.subr.bf16.mxu0 %v720_v35  ;;  %665 = vmatprep.subr.bf16.mxu1 %v721_v36 }
  0x5a   :  { %644 = vmatpush3.bf16.msra.mxu0 %v722_v37  ;;  %666 = vmatpush3.bf16.msra.mxu1 %v723_v38 }
  0x5b   :  { %645 = vmatprep.subr.bf16.mxu0 %v724_v39  ;;  %667 = vmatprep.subr.bf16.mxu1 %v725_v40 }
  0x5e   :  { %646 = vmatpush3.bf16.msra.mxu0 %v726_v41  ;;  %668 = vmatpush3.bf16.msra.mxu1 %v727_v42 }
 0x114   :  { %v171_v54 = vpop.f32.mrb[0].mxu0  ;;  %v212_v55 = vpop.f32.mrb[0].mxu1 }
 0x115   :  { %v172_v56 = vadd.f32 %v171_v54, %v76_v50  ;;  %v213_v57 = vadd.f32 %v212_v55, %v84_v51  ;;  %v173_v58 = vpop.f32.mrb[1].mxu0  ;;  %v214_v59 = vpop.f32.mrb[1].mxu1 }
 0x116   :  { %v174_v60 = vadd.f32 %v173_v58, %v80_v52  ;;  %v215_v61 = vadd.f32 %v214_v59, %v88_v53  ;;  %v175_v62 = vpop.f32.mrb[2].mxu0  ;;  %v216_v63 = vpop.f32.mrb[2].mxu1 }
 0x117   :  { %v219_v0 = vmax.f32 %v172_v56, 0.0  ;;  %v221_v1 = vmax.f32 %v213_v57, 0.0  ;;  %v176_v2 = vpop.f32.mrb[3].mxu0  ;;  %v217_v3 = vpop.f32.mrb[3].mxu1 }
 0x118   :  { %v220_v4 = vmax.f32 %v174_v60, 0.0  ;;  %v222_v5 = vmax.f32 %v215_v61, 0.0 }
 0x119   :  { %v225_v6 = vpack.c.bf16 %v221_v1, %v221_v1  ;;  %v223_v9 = vpack.c.bf16 %v219_v0, %v219_v0 }
 0x11a   :  { %v224_v7 = vpack.c.bf16 %v220_v4, %v220_v4  ;;  %v226_v8 = vpack.c.bf16 %v222_v5, %v222_v5 }
 0x11c   :  { %522 = vmatprep.mubr.bf16.mxu0 %v224_v7  ;;  %562 = vmatprep.mubr.bf16.mxu1 %v226_v8 }
 0x11d   :  { %523 = vmatmul.mubr.bf16.vlgmr.msra.gmra.mrb[4].mxu0 %v223_v9  ;;  %563 = vmatmul.mubr.bf16.vlgmr.msra.gmra.mrb[4].mxu1 %v225_v6 }
 0x1f0   :  { %v647_v10 = vpop.f32.mrb[4].mxu0  ;;  %v669_v11 = vpop.f32.mrb[4].mxu1 }
 0x1f1   :  { %v648_v13 = vpop.f32.mrb[5].mxu0  ;;  %v670_v14 = vpop.f32.mrb[5].mxu1 }
 0x1f2   :  { %v649_v15 = vadd.f32 %v648_v13, %v647_v10  ;;  %v671_v16 = vadd.f32 %v670_v14, %v669_v11  ;;  %v650_v17 = vpop.f32.mrb[6].mxu0  ;;  %v672_v18 = vpop.f32.mrb[6].mxu1 }
 0x1f3   :  { %v651_v19 = vpop.f32.mrb[7].mxu0  ;;  %v673_v20 = vpop.f32.mrb[7].mxu1 }
 0x1f4   :  { %v525_v21 = vadd.f32 %v649_v15, %v598_v12 }
 0x1f6   :  { %v565_v22 = vadd.f32 %v671_v16, %v525_v21 }
 0x1f8   :  { %v570_v23 = vpack.c.bf16 %v565_v22, %v565_v22 }
 0x1fa   :  { %571 = vst [vmem:[#allocation8] sm:$0xf] %v570_v23 }
 0x1fb   :  { %805 = shalt.err (!%p802_p0)
}
 0x1fc   :  { %s806_s12 = scalar_lea.hbm %s920_s5, 64 }
 0x1fd   :  { %p807_p1 = scmp.ne.s32.totalorder %s920_s5, %s806_s12  ;;  %p810_p2 = scmp.lt.u32.totalorder %s806_s12, %s920_s5 }
 0x1ff   :  { %p812_p3 = pnand %p810_p2, %p807_p1 }
 0x201   :  { %815 = shalt.err (!%p812_p3)
}
 0x202   :  { %581 = dma.vmem_to_hbm [thread:$0]  %s579_s9, 64, %s920_s5, [#allocation4]  }
 0x203   :  { %820 = dma.done.wait [#allocation4], 64  }
 0x204   :  { %821 = vsyncadd [#allocation4], 4294967232 }
 0x205   :  { %585 = vsyncpa [#allocation3], 1 }
 0x206   :  { %586 = vsyncpa [#allocation6], 1 }
 0x207   :  { %587 = vsyncpa [#allocation4], 1 }

</bundles_post_ra>
